<compile_context>
chip_gen: v7x
topology: tpu7x:2x2x1
jax: 0.10.0
libtpu: 0.0.40
codegen_flags: <defaults>
</compile_context>

<pallas_src>
import jax
import jax.numpy as jnp
from jax.experimental import pallas as pl
from jax.experimental.pallas import tpu as pltpu


def _broadcast_kernel(logits_ref, out_ref):
    # logits_ref: (1, ft)  — one lane-block of the flattened parameter
    #                        (same block every batch step -> stays resident).
    # out_ref:    (bt, ft) — one output tile; broadcast the row over it.
    out_ref[...] = jnp.broadcast_to(logits_ref[...], out_ref.shape)


def _sublane_multiple(dtype):
    itemsize = jnp.dtype(dtype).itemsize
    return max(8, 32 // itemsize)   # 8 for f32, 16 for bf16, 32 for int8/fp8


def learned_adjacency_forward(
    inputs,
    logits,
    *,
    vmem_out_budget_bytes=12 * 1024 * 1024,  # output double-buffer budget; fits
                                             # v5e's 16 MiB scoped default with room
    fast_path_bytes=1 * 1024 * 1024,
    force_kernel=False,
):
    """Replicates LearnedAdjacancy.forward: repeat logits along the batch dim.

    inputs: any array whose leading dim is the batch size (only shape[0] used).
    logits: (1, E, T) parameter with E = n_nodes*(n_nodes-1), T = n_edge_types.
    returns: (B, E, T) array of the same dtype as logits.
    """
    batch_size = int(inputs.shape[0])
    _, n_edges, n_edge_types = logits.shape
    flat = n_edges * n_edge_types
    dtype = logits.dtype
    itemsize = jnp.dtype(dtype).itemsize
    out_shape3 = (batch_size, n_edges, n_edge_types)

    total_out_bytes = batch_size * flat * itemsize

    # ---------------- Fast path: kernel is pure overhead at this size -------
    if not force_kernel and (total_out_bytes < fast_path_bytes or flat < 128):
        return jnp.broadcast_to(logits, out_shape3)

    # ---------------- Lane widening (rows are identical -> exact) -----------
    k = 1
    if flat < 512:
        while (batch_size % (2 * k) == 0) and (k * flat) < 1024:
            k *= 2
    b2 = batch_size // k
    f2 = k * flat
    logits2d = logits.reshape(1, flat)
    if k > 1:
        logits2d = jnp.tile(logits2d, (1, k))   # tiny, done once outside kernel

    # ---------------- VMEM-safe tiling ---------------------------------------
    sub = _sublane_multiple(dtype)
    per_buf = max(vmem_out_budget_bytes // 2, sub * 128 * itemsize)

    # Lane tile: full row if `sub` rows fit per buffer; else a multiple-of-128
    # slice, preferring one that divides f2 evenly (no ragged last block).
    if sub * f2 * itemsize <= per_buf or f2 <= 128:
        ft = f2
    else:
        max_ft = max(128, (per_buf // (sub * itemsize)) // 128 * 128)
        ft = max_ft
        for cand in range(max_ft, 127, -128):
            if f2 % cand == 0:
                ft = cand
                break

    # Batch tile.
    max_rows = max(1, per_buf // (ft * itemsize))
    if b2 <= max_rows:
        bt = b2
        # Give v7x's second TensorCore work when the whole batch would land in
        # a single block (extra grid step is negligible on v5e/v6e).
        if ft == f2 and b2 >= 2 * sub:
            half = ((-(-b2 // 2)) + sub - 1) // sub * sub
            if half < b2:
                bt = half
    else:
        bt = max(sub, (max_rows // sub) * sub)

    grid = (pl.cdiv(b2, bt), pl.cdiv(f2, ft))

    # Explicit VMEM limit: output double-buffer + (resident) input + headroom.
    needed = 2 * bt * ft * itemsize + 2 * ft * itemsize
    vmem_limit = min(max(needed + 2 * 1024 * 1024, 4 * 1024 * 1024),
                     48 * 1024 * 1024)   # stay inside v7x's 64 MiB physical VMEM

    cost = pl.CostEstimate(
        flops=0,
        transcendentals=0,
        bytes_accessed=total_out_bytes + flat * itemsize,
    )

    out2d = pl.pallas_call(
        _broadcast_kernel,
        out_shape=jax.ShapeDtypeStruct((b2, f2), dtype),
        grid=grid,
        in_specs=[
            pl.BlockSpec((1, ft), lambda b, f: (0, f)),
        ],
        out_specs=pl.BlockSpec((bt, ft), lambda b, f: (b, f)),
        compiler_params=pltpu.CompilerParams(
            dimension_semantics=("parallel", "parallel"),
            vmem_limit_bytes=vmem_limit,
        ),
        cost_estimate=cost,
    )(logits2d)

    return out2d.reshape(out_shape3)


def make_logits(n_nodes, n_edge_types, dtype=jnp.float32):
    """Matches the module's __init__: log(ones * 0.5) == log(0.5) everywhere."""
    n_edges = n_nodes * (n_nodes - 1)
    return jnp.full((1, n_edges, n_edge_types), jnp.log(0.5), dtype=dtype)


if __name__ == "__main__":
    key = jax.random.PRNGKey(0)
    k_in, k_rec, k_send, k_in2 = jax.random.split(key, 4)

    n_timesteps, n_dims = 8, 4

    # ---- Case 1: module-sized shapes (takes the fast path) -----------------
    batch_size, n_nodes, n_edge_types = 2, 5, 2
    n_edges = n_nodes * (n_nodes - 1)
    inputs = jax.random.normal(
        k_in, (batch_size, n_nodes, n_timesteps, n_dims), dtype=jnp.float32)
    rel_rec = jax.random.normal(k_rec, (n_edges, n_nodes), dtype=jnp.float32)    # unused by forward
    rel_send = jax.random.normal(k_send, (n_edges, n_nodes), dtype=jnp.float32)  # unused by forward
    logits = make_logits(n_nodes, n_edge_types)

    out = jax.block_until_ready(learned_adjacency_forward(inputs, logits))
    ref = jnp.broadcast_to(logits, (batch_size, n_edges, n_edge_types))
    assert out.shape == ref.shape and out.dtype == jnp.float32
    assert bool(jnp.array_equal(out, ref))

    # ---- Case 2: exercise the Pallas kernel (lane widening, single tile) ---
    b2_, n2_, t2_ = 16, 12, 2
    e2_ = n2_ * (n2_ - 1)
    inputs2 = jax.random.normal(
        k_in2, (b2_, n2_, n_timesteps, n_dims), dtype=jnp.float32)
    logits2 = make_logits(n2_, t2_)
    out2 = jax.block_until_ready(
        learned_adjacency_forward(inputs2, logits2, force_kernel=True))
    ref2 = jnp.broadcast_to(logits2, (b2_, e2_, t2_))
    assert out2.shape == ref2.shape and out2.dtype == jnp.float32
    assert bool(jnp.array_equal(out2, ref2))

    # ---- Case 3: exercise multi-tile grid (lane + batch tiling path) -------
    b3_, n3_, t3_ = 64, 5, 2
    e3_ = n3_ * (n3_ - 1)
    inputs3 = jnp.zeros((b3_, n3_, n_timesteps, n_dims), dtype=jnp.float32)
    logits3 = make_logits(n3_, t3_)
    out3 = jax.block_until_ready(
        learned_adjacency_forward(
            inputs3, logits3, force_kernel=True,
            vmem_out_budget_bytes=64 * 1024))
    ref3 = jnp.broadcast_to(logits3, (b3_, e3_, t3_))
    assert out3.shape == ref3.shape and out3.dtype == jnp.float32
    assert bool(jnp.array_equal(out3, ref3))

    print("KERNEL_OK")
</pallas_src>

<mosaic_0001>
module attributes {stable_mosaic.version = 11 : i64} {
  func.func @_broadcast_kernel(%arg0: i32, %arg1: i32, %arg2: memref<1x1056xf32, #tpu.memory_space<vmem>>, %arg3: memref<4x1056xf32, #tpu.memory_space<vmem>>) attributes {dimension_semantics = [#tpu.dimension_semantics<parallel>, #tpu.dimension_semantics<parallel>], iteration_bounds = array<i64: 1, 1>, scalar_prefetch = 0 : i64, scratch_operands = 0 : i64, tpu.core_type = #tpu.core_type<tc>, window_params = [{transform_indices = @transform_0, window_bounds = array<i64: 1, 1056>}, {transform_indices = @transform_1, window_bounds = array<i64: 4, 1056>}]} {
    %c0 = arith.constant 0 : index
    %c0_0 = arith.constant 0 : index
    %0 = vector.load %arg2[%c0, %c0_0] : memref<1x1056xf32, #tpu.memory_space<vmem>>, vector<1x1056xf32>
    %1 = vector.shape_cast %0 : vector<1x1056xf32> to vector<1x1056xf32>
    %2 = vector.broadcast %1 : vector<1x1056xf32> to vector<4x1056xf32>
    %c0_1 = arith.constant 0 : index
    %c0_2 = arith.constant 0 : index
    %3 = vector.load %arg3[%c0_1, %c0_2] : memref<4x1056xf32, #tpu.memory_space<vmem>>, vector<4x1056xf32>
    tpu.vector_store %arg3[%c0_1, %c0_2], %2 {strides = array<i32>} : memref<4x1056xf32, #tpu.memory_space<vmem>>, vector<4x1056xf32>,
    return
  }
  func.func @transform_0(%arg0: i32, %arg1: i32) -> (i32, i32) {
    %c0_i32 = arith.constant 0 : i32
    %c0_i32_0 = arith.constant 0 : i32
    return %c0_i32, %arg1 : i32, i32
  }
  func.func @transform_1(%arg0: i32, %arg1: i32) -> (i32, i32) {
    %c0_i32 = arith.constant 0 : i32
    return %arg0, %arg1 : i32, i32
  }
}

</mosaic_0001>

<bundles_post_ra>
// kernel: tpu_custom_call.1
= control target key start
LH: loop header
LB: loop body
LE: loop exit
PB: predicated region body
PF: predicated region fallthrough
CT: control target
= control target key end

     0   :  { %6 = vsyncpa [#allocation3], 0  ;;  %s178_s0 = inlined_call_operand.hbm [shape: f32[1,1056], index: 0, kind: input, shape index: {}]   ;;  %s179_s1 = inlined_call_operand.hbm [shape: f32[4,1056], index: 1, kind: output, shape index: {}]  }
   0x1   :  { %7 = vsyncpa [#allocation4], 0  ;;  %s142_s6 = smov [#allocation2]   ;;  %s94_s10 = scalar_lea.hbm %s178_s0, 144 }
   0x2   :  { %s14_s7 = sshll.u32 %s142_s6, 4  ;;  %p95_p0 = scmp.ne.s32.totalorder %s178_s0, %s94_s10  ;;  %s15_s7 = int_to_ptr.vmem [resolvable:$true] %s14_s7 }
   0x3   :  { %p98_p1 = scmp.lt.u32.totalorder %s94_s10, %s178_s0 }
   0x5   :  { %p100_p2 = pnand %p98_p1, %p95_p0 }
   0x7   :  { %103 = shalt.err (!%p100_p2)
}
   0x8   :  { %s104_s15 = scalar_lea.vmem %s15_s7, 144  ;;  %s108_s16 = scalar_lea.vmem %s15_s7, 160 }
   0x9   :  { %p105_p3 = scmp.ne.s32.totalorder %s15_s7, %s104_s15  ;;  %p109_p4 = scmp.lt.s32.totalorder %s15_s7, %s15_s7 }
   0xa   :  { %p110_p5 = scmp.lt.s32.totalorder %s108_s16, %s104_s15 }
   0xc   :  { %p111_p6 = por %p110_p5, %p109_p4 }
   0xe   :  { %p112_p7 = pnand %p111_p6, %p105_p3 }
  0x10   :  { %115 = shalt.err (!%p112_p7)
}
  0x11   :  { %17 = dma.hbm_to_vmem [thread:$0]  %s178_s0, 144, %s15_s7, [#allocation3]  }
  0x12   :  { %138 = dma.done.wait [#allocation3], 144  }
  0x13   :  { %139 = vsyncadd [#allocation3], 4294967152  ;;  %v25_v0 = vlaneseq  ;;  %vm74_vm0 = vcmask 257024   ;;  %v21_v10 = vld [vmem:[#allocation2] sm:$0xff]  ;;  %v91_v11 = vld [vmem:[#allocation2 + $0x8] ss:$0 sm:$0xff] }
  0x14   :  { %75 = vst.msk [vmem:[#allocation5 + $0x20] sm:$0xf] %vm74_vm0, %v91_v11  ;;  %s143_s0 = smov [#allocation5]  }
  0x15   :  { %v26_v1 = vshrl.u32 %v25_v0, 7  ;;  %s82_s19 = sshll.u32 %s143_s0, 4  ;;  %s83_s19 = int_to_ptr.vmem [resolvable:$true] %s82_s19 }
  0x16   :  { %s116_s20 = scalar_lea.vmem %s83_s19, 576  ;;  %p121_p9 = scmp.lt.s32.totalorder %s83_s19, %s83_s19 }
  0x17   :  { %v27_v2 = vsub.s32 0, %v26_v1  ;;  %v31_v3 = vsub.s32 1, %v26_v1  ;;  %v35_v4 = vsub.s32 2, %v26_v1  ;;  %v39_v5 = vsub.s32 3, %v26_v1  ;;  %p117_p8 = scmp.ne.s32.totalorder %s83_s19, %s116_s20  ;;  %p122_p10 = scmp.lt.s32.totalorder %s116_s20, %s116_s20 }
  0x18   :  { %v43_v6 = vsub.s32 4, %v26_v1  ;;  %v47_v7 = vsub.s32 5, %v26_v1  ;;  %v51_v8 = vsub.s32 6, %v26_v1  ;;  %v55_v9 = vsub.s32 7, %v26_v1 }
  0x19   :  { %v28_v12 = vrot.slane %v21_v10, %v27_v2  ;;  %v32_v13 = vrot.slane %v21_v10, %v31_v3  ;;  %v36_v14 = vrot.slane %v21_v10, %v35_v4  ;;  %v40_v15 = vrot.slane %v21_v10, %v39_v5  ;;  %p123_p11 = por %p122_p10, %p121_p9 }
  0x1a   :  { %v44_v16 = vrot.slane %v21_v10, %v43_v6  ;;  %v48_v17 = vrot.slane %v21_v10, %v47_v7  ;;  %v52_v18 = vrot.slane %v21_v10, %v51_v8  ;;  %v56_v19 = vrot.slane %v21_v10, %v55_v9 }
  0x1b   :  { %v62_v20 = vcombine.low %v28_v12, %v32_v13  ;;  %v63_v21 = vcombine.low %v36_v14, %v40_v15  ;;  %p124_p12 = pnand %p123_p11, %p117_p8 }
  0x1c   :  { %v64_v22 = vcombine.low %v44_v16, %v48_v17  ;;  %v65_v23 = vcombine.low %v52_v18, %v56_v19 }
  0x1d   :  { %70 = vst [vmem:[#allocation5] sm:$0xff] %v62_v20  ;;  %71 = vst [vmem:[#allocation5 + $0x8] sm:$0xff] %v63_v21 }
  0x1e   :  { %72 = vst [vmem:[#allocation5 + $0x10] sm:$0xff] %v64_v22  ;;  %73 = vst [vmem:[#allocation5 + $0x18] sm:$0xff] %v65_v23 }
  0x1f   :  { %127 = shalt.err (!%p124_p12)
}
  0x20   :  { %s128_s23 = scalar_lea.hbm %s179_s1, 576 }
  0x21   :  { %p129_p13 = scmp.ne.s32.totalorder %s179_s1, %s128_s23  ;;  %p132_p0 = scmp.lt.u32.totalorder %s128_s23, %s179_s1 }
  0x23   :  { %p134_p1 = pnand %p132_p0, %p129_p13 }
  0x25   :  { %137 = shalt.err (!%p134_p1)
}
  0x26   :  { %85 = dma.vmem_to_hbm [thread:$0]  %s83_s19, 576, %s179_s1, [#allocation4]  }
  0x27   :  { %140 = dma.done.wait [#allocation4], 576  }
  0x28   :  { %141 = vsyncadd [#allocation4], 4294966720 }
  0x29   :  { %89 = vsyncpa [#allocation3], 1 }
  0x2a   :  { %90 = vsyncpa [#allocation4], 1 }

</bundles_post_ra>
